<compile_context>
chip_gen: v6e
topology: v6e:2x2x1
jax: 0.10.0
libtpu: 0.0.40
codegen_flags: <defaults>
</compile_context>

<pallas_src>
import functools

import jax
import jax.numpy as jnp
import numpy as np
from jax import lax
from jax.experimental import pallas as pl
from jax.experimental.pallas import tpu as pltpu

LANES = 128
SUBLANES = 8
N_STATS = 10           # rows: [sum d^2, sum p, sum t, sum p^2, sum t^2, sum p*t,
                       #        min p, min t, max p, max t]
OUT_ROWS = 16          # stat rows padded to a sublane-aligned (16, 128) slab
DEFAULT_TILE_ROWS = 4096
MIN_SPLIT_ROWS = 512   # once rows >= 2*this, force >= 2 blocks (v7x megacore)


def _round_up(x, m):
    return -(-x // m) * m


def _stats_kernel(pred_ref, targ_ref, out_ref, *, n_valid, tile_rows,
                  grid_n, needs_mask):
    """Per-block per-LANE partial statistics over a (tile_rows, 128) tile."""
    i = pl.program_id(0)
    p = pred_ref[...].astype(jnp.float32)   # (tile_rows, 128)
    t = targ_ref[...].astype(jnp.float32)

    def emit(valid):
        pv, tv = p, t
        if valid is not None:
            # Zero invalid slots so the sums ignore padding / OOB rows.
            pv = jnp.where(valid, pv, 0.0)
            tv = jnp.where(valid, tv, 0.0)
        d = pv - tv
        s_dd = jnp.sum(d * d, axis=0, keepdims=True)       # (1, 128)
        s_p = jnp.sum(pv, axis=0, keepdims=True)
        s_t = jnp.sum(tv, axis=0, keepdims=True)
        s_pp = jnp.sum(pv * pv, axis=0, keepdims=True)
        s_tt = jnp.sum(tv * tv, axis=0, keepdims=True)
        s_pt = jnp.sum(pv * tv, axis=0, keepdims=True)
        if valid is not None:
            inf = jnp.float32(jnp.inf)
            p_lo = jnp.where(valid, pv, inf)
            t_lo = jnp.where(valid, tv, inf)
            p_hi = jnp.where(valid, pv, -inf)
            t_hi = jnp.where(valid, tv, -inf)
        else:
            p_lo = p_hi = pv
            t_lo = t_hi = tv
        mn_p = jnp.min(p_lo, axis=0, keepdims=True)
        mn_t = jnp.min(t_lo, axis=0, keepdims=True)
        mx_p = jnp.max(p_hi, axis=0, keepdims=True)
        mx_t = jnp.max(t_hi, axis=0, keepdims=True)
        slab = jnp.concatenate(
            [s_dd, s_p, s_t, s_pp, s_tt, s_pt, mn_p, mn_t, mx_p, mx_t,
             jnp.zeros((OUT_ROWS - N_STATS, LANES), jnp.float32)],
            axis=0)                                         # (16, 128)
        out_ref[0] = slab

    def make_mask():
        row = lax.broadcasted_iota(jnp.int32, (tile_rows, LANES), 0)
        lane = lax.broadcasted_iota(jnp.int32, (tile_rows, LANES), 1)
        gidx = (i * tile_rows + row) * LANES + lane
        return gidx < n_valid

    if not needs_mask:
        emit(None)                       # exact fit: never any padding
    elif grid_n == 1:
        emit(make_mask())                # single (last) block, always masked
    else:
        last = grid_n - 1

        @pl.when(i != last)
        def _():
            emit(None)                   # interior blocks: zero mask cost

        @pl.when(i == last)
        def _():
            emit(make_mask())            # only the last block can be ragged


def _value_loss_partials(pred, targ, tile_rows=DEFAULT_TILE_ROWS):
    """Returns (grid_n, 16, 128) per-lane partial-stat slabs."""
    assert pred.shape == targ.shape, (pred.shape, targ.shape)
    n_valid = int(np.prod(pred.shape))
    assert n_valid >= 1

    if n_valid % (SUBLANES * LANES) == 0:
        # Zero-copy path: contiguous reshape to a lane-dense slab, no HBM copy.
        rows = n_valid // LANES

        def prep(x):
            return jnp.reshape(x, (rows, LANES))
    else:
        # Ragged fallback: pad only up to sublane alignment.
        rows = _round_up(-(-n_valid // LANES), SUBLANES)

        def prep(x):
            xf = jnp.reshape(x, (-1,))
            xf = jnp.pad(xf, (0, rows * LANES - n_valid))
            return jnp.reshape(xf, (rows, LANES))

    tile_rows = max(SUBLANES, min(int(tile_rows), rows))
    tile_rows = _round_up(tile_rows, SUBLANES)
    if rows >= 2 * MIN_SPLIT_ROWS:
        # Guarantee >= 2 blocks so the "parallel" grid axis can shard across
        # both v7x TensorCores (single-TC v5e/v6e: one extra cheap step).
        tile_rows = min(tile_rows, _round_up(-(-rows // 2), SUBLANES))
    grid_n = -(-rows // tile_rows)

    # In-kernel mask uses int32 global indices.
    assert grid_n * tile_rows * LANES < 2**31, "input too large for int32 indexing"

    needs_mask = (grid_n * tile_rows * LANES != n_valid)

    p2 = prep(pred)
    t2 = prep(targ)

    kernel = functools.partial(_stats_kernel, n_valid=n_valid,
                               tile_rows=tile_rows, grid_n=grid_n,
                               needs_mask=needs_mask)
    return pl.pallas_call(
        kernel,
        out_shape=jax.ShapeDtypeStruct((grid_n, OUT_ROWS, LANES), jnp.float32),
        grid_spec=pltpu.PrefetchScalarGridSpec(
            num_scalar_prefetch=0,
            grid=(grid_n,),
            in_specs=[
                pl.BlockSpec((tile_rows, LANES), lambda i: (i, 0)),
                pl.BlockSpec((tile_rows, LANES), lambda i: (i, 0)),
            ],
            # Independent per-block partials (lane-dense) -> "parallel" axis.
            out_specs=pl.BlockSpec((1, OUT_ROWS, LANES), lambda i: (i, 0, 0)),
        ),
        compiler_params=pltpu.CompilerParams(
            dimension_semantics=("parallel",),
            vmem_limit_bytes=32 * 1024 * 1024,
        ),
    )(p2, t2)


def value_loss(pred, targ, tile_rows=DEFAULT_TILE_ROWS):
    """Pallas equivalent of ValueLoss.forward (with L2 element loss)."""
    B = pred.shape[0]
    n = float(np.prod(pred.shape))  # mean over all elements, matching .mean()

    partials = _value_loss_partials(pred, targ, tile_rows)  # (G, 16, 128)

    s_dd = jnp.sum(partials[:, 0, :])
    s_p = jnp.sum(partials[:, 1, :])
    s_t = jnp.sum(partials[:, 2, :])
    s_pp = jnp.sum(partials[:, 3, :])
    s_tt = jnp.sum(partials[:, 4, :])
    s_pt = jnp.sum(partials[:, 5, :])
    min_pred = jnp.min(partials[:, 6, :])
    min_targ = jnp.min(partials[:, 7, :])
    max_pred = jnp.max(partials[:, 8, :])
    max_targ = jnp.max(partials[:, 9, :])

    loss = s_dd / n
    mean_pred = s_p / n
    mean_targ = s_t / n

    if B > 1:
        # Pearson correlation from accumulated moments (== np.corrcoef[0,1]).
        cov = s_pt / n - mean_pred * mean_targ
        var_p = s_pp / n - mean_pred * mean_pred
        var_t = s_tt / n - mean_targ * mean_targ
        corr = cov / jnp.sqrt(var_p * var_t)
    else:
        corr = jnp.float32(jnp.nan)

    info = {
        "mean_pred": mean_pred,
        "mean_targ": mean_targ,
        "min_pred": min_pred,
        "min_targ": min_targ,
        "max_pred": max_pred,
        "max_targ": max_targ,
        "corr": corr,
    }
    return loss, info


if __name__ == "__main__":
    key = jax.random.PRNGKey(0)
    k1, k2 = jax.random.split(key)

    # --- Small batch (single masked block, ragged) ---
    B = 64
    pred = jax.random.normal(k1, (B, 1), dtype=jnp.float32)
    targ = pred + 0.1 * jax.random.normal(k2, (B, 1), dtype=jnp.float32)

    loss, info = value_loss(pred, targ)
    jax.block_until_ready(loss)
    jax.block_until_ready(info["corr"])

    p_np = np.asarray(pred, dtype=np.float64)
    t_np = np.asarray(targ, dtype=np.float64)
    ref_loss = np.mean((p_np - t_np) ** 2)
    ref_corr = np.corrcoef(p_np.squeeze(), t_np.squeeze())[0, 1]

    assert np.allclose(float(loss), ref_loss, rtol=1e-3, atol=1e-5), (float(loss), ref_loss)
    assert np.allclose(float(info["corr"]), ref_corr, rtol=1e-3, atol=1e-4)
    assert np.allclose(float(info["mean_pred"]), p_np.mean(), rtol=1e-3, atol=1e-5)
    assert np.allclose(float(info["min_targ"]), t_np.min(), rtol=1e-3, atol=1e-5)
    assert np.allclose(float(info["max_pred"]), p_np.max(), rtol=1e-3, atol=1e-5)

    # --- Ragged batch, tiny tiles to force grid > 1 (masked last block) ---
    B2 = 2000
    k3, k4 = jax.random.split(k2)
    pred2 = jax.random.normal(k3, (B2, 1), dtype=jnp.float32)
    targ2 = 0.5 * pred2 + 0.3 * jax.random.normal(k4, (B2, 1), dtype=jnp.float32)

    loss2, info2 = value_loss(pred2, targ2, tile_rows=8)
    jax.block_until_ready(loss2)
    jax.block_until_ready(info2["corr"])

    p2n = np.asarray(pred2, dtype=np.float64)
    t2n = np.asarray(targ2, dtype=np.float64)
    assert np.allclose(float(loss2), np.mean((p2n - t2n) ** 2), rtol=1e-3, atol=1e-5)
    assert np.allclose(
        float(info2["corr"]),
        np.corrcoef(p2n.squeeze(), t2n.squeeze())[0, 1],
        rtol=1e-3, atol=1e-4,
    )
    assert np.allclose(float(info2["mean_targ"]), t2n.mean(), rtol=1e-3, atol=1e-5)
    assert np.allclose(float(info2["min_pred"]), p2n.min(), rtol=1e-3, atol=1e-5)
    assert np.allclose(float(info2["max_targ"]), t2n.max(), rtol=1e-3, atol=1e-5)

    # --- Exact-fit batch (zero-copy reshape, no mask, grid > 1), bf16 input ---
    B3 = 2048
    k5, k6 = jax.random.split(k4)
    pred3 = jax.random.normal(k5, (B3, 1), dtype=jnp.bfloat16)
    targ3 = (pred3.astype(jnp.float32)
             + 0.2 * jax.random.normal(k6, (B3, 1), dtype=jnp.float32)
             ).astype(jnp.bfloat16)

    loss3, info3 = value_loss(pred3, targ3, tile_rows=8)
    jax.block_until_ready(loss3)
    jax.block_until_ready(info3["corr"])

    p3n = np.asarray(pred3.astype(jnp.float32), dtype=np.float64)
    t3n = np.asarray(targ3.astype(jnp.float32), dtype=np.float64)
    assert np.allclose(float(loss3), np.mean((p3n - t3n) ** 2), rtol=1e-3, atol=1e-5)
    assert np.allclose(
        float(info3["corr"]),
        np.corrcoef(p3n.squeeze(), t3n.squeeze())[0, 1],
        rtol=1e-3, atol=1e-3,
    )
    assert np.allclose(float(info3["mean_pred"]), p3n.mean(), rtol=1e-3, atol=1e-5)
    assert np.allclose(float(info3["min_targ"]), t3n.min(), rtol=1e-3, atol=1e-5)
    assert np.allclose(float(info3["max_targ"]), t3n.max(), rtol=1e-3, atol=1e-5)

    print("KERNEL_OK")
</pallas_src>

<mosaic_0001>
module attributes {stable_mosaic.version = 11 : i64} {
  func.func @_stats_kernel(%arg0: i32, %arg1: memref<8x128xf32, #tpu.memory_space<vmem>>, %arg2: memref<8x128xf32, #tpu.memory_space<vmem>>, %arg3: memref<1x16x128xf32, #tpu.memory_space<vmem>>) attributes {dimension_semantics = [#tpu.dimension_semantics<parallel>], iteration_bounds = array<i64: 1>, scalar_prefetch = 0 : i64, scratch_operands = 0 : i64, tpu.core_type = #tpu.core_type<tc>, window_params = [{transform_indices = @transform_0, window_bounds = array<i64: 8, 128>}, {transform_indices = @transform_1, window_bounds = array<i64: 8, 128>}, {transform_indices = @transform_2, window_bounds = array<i64: 1, 16, 128>}]} {
    %c0 = arith.constant 0 : index
    %c0_0 = arith.constant 0 : index
    %0 = vector.load %arg1[%c0, %c0_0] : memref<8x128xf32, #tpu.memory_space<vmem>>, vector<8x128xf32>
    %c0_1 = arith.constant 0 : index
    %c0_2 = arith.constant 0 : index
    %1 = vector.load %arg2[%c0_1, %c0_2] : memref<8x128xf32, #tpu.memory_space<vmem>>, vector<8x128xf32>
    %2 = tpu.iota {dimensions = array<i32: 0>} : vector<8x128xi32>
    %3 = tpu.iota {dimensions = array<i32: 1>} : vector<8x128xi32>
    %c8_i32 = arith.constant 8 : i32
    %4 = arith.muli %arg0, %c8_i32 : i32
    %5 = vector.broadcast %4 : i32 to vector<8x128xi32>
    %6 = arith.addi %5, %2 : vector<8x128xi32>
    %c128_i32 = arith.constant 128 : i32
    %7 = vector.broadcast %c128_i32 : i32 to vector<8x128xi32>
    %8 = arith.muli %6, %7 : vector<8x128xi32>
    %9 = arith.addi %8, %3 : vector<8x128xi32>
    %c64_i32 = arith.constant 64 : i32
    %10 = vector.broadcast %c64_i32 : i32 to vector<8x128xi32>
    %11 = arith.cmpi slt, %9, %10 : vector<8x128xi32>
    %cst = arith.constant 0.000000e+00 : f32
    %12 = vector.broadcast %cst : f32 to vector<8x128xf32>
    %13 = arith.select %11, %0, %12 : vector<8x128xi1>, vector<8x128xf32>
    %cst_3 = arith.constant 0.000000e+00 : f32
    %14 = vector.broadcast %cst_3 : f32 to vector<8x128xf32>
    %15 = arith.select %11, %1, %14 : vector<8x128xi1>, vector<8x128xf32>
    %16 = arith.subf %13, %15 : vector<8x128xf32>
    %17 = arith.mulf %16, %16 : vector<8x128xf32>
    %cst_4 = arith.constant dense<0.000000e+00> : vector<128xf32>
    %18 = vector.multi_reduction <add>, %17, %cst_4 [0] : vector<8x128xf32> to vector<128xf32>
    %19 = vector.shape_cast %18 : vector<128xf32> to vector<1x128xf32>
    %cst_5 = arith.constant dense<0.000000e+00> : vector<128xf32>
    %20 = vector.multi_reduction <add>, %13, %cst_5 [0] : vector<8x128xf32> to vector<128xf32>
    %21 = vector.shape_cast %20 : vector<128xf32> to vector<1x128xf32>
    %cst_6 = arith.constant dense<0.000000e+00> : vector<128xf32>
    %22 = vector.multi_reduction <add>, %15, %cst_6 [0] : vector<8x128xf32> to vector<128xf32>
    %23 = vector.shape_cast %22 : vector<128xf32> to vector<1x128xf32>
    %24 = arith.mulf %13, %13 : vector<8x128xf32>
    %cst_7 = arith.constant dense<0.000000e+00> : vector<128xf32>
    %25 = vector.multi_reduction <add>, %24, %cst_7 [0] : vector<8x128xf32> to vector<128xf32>
    %26 = vector.shape_cast %25 : vector<128xf32> to vector<1x128xf32>
    %27 = arith.mulf %15, %15 : vector<8x128xf32>
    %cst_8 = arith.constant dense<0.000000e+00> : vector<128xf32>
    %28 = vector.multi_reduction <add>, %27, %cst_8 [0] : vector<8x128xf32> to vector<128xf32>
    %29 = vector.shape_cast %28 : vector<128xf32> to vector<1x128xf32>
    %30 = arith.mulf %13, %15 : vector<8x128xf32>
    %cst_9 = arith.constant dense<0.000000e+00> : vector<128xf32>
    %31 = vector.multi_reduction <add>, %30, %cst_9 [0] : vector<8x128xf32> to vector<128xf32>
    %32 = vector.shape_cast %31 : vector<128xf32> to vector<1x128xf32>
    %cst_10 = arith.constant 0x7F800000 : f32
    %33 = vector.broadcast %cst_10 : f32 to vector<8x128xf32>
    %34 = arith.select %11, %13, %33 : vector<8x128xi1>, vector<8x128xf32>
    %cst_11 = arith.constant 0x7F800000 : f32
    %35 = vector.broadcast %cst_11 : f32 to vector<8x128xf32>
    %36 = arith.select %11, %15, %35 : vector<8x128xi1>, vector<8x128xf32>
    %cst_12 = arith.constant 0.000000e+00 : f32
    %cst_13 = arith.constant 0x7F800000 : f32
    %37 = arith.subf %cst_12, %cst_13 : f32
    %38 = vector.broadcast %37 : f32 to vector<8x128xf32>
    %39 = arith.select %11, %13, %38 : vector<8x128xi1>, vector<8x128xf32>
    %cst_14 = arith.constant 0.000000e+00 : f32
    %cst_15 = arith.constant 0x7F800000 : f32
    %40 = arith.subf %cst_14, %cst_15 : f32
    %41 = vector.broadcast %40 : f32 to vector<8x128xf32>
    %42 = arith.select %11, %15, %41 : vector<8x128xi1>, vector<8x128xf32>
    %cst_16 = arith.constant dense<0x7F800000> : vector<128xf32>
    %43 = vector.multi_reduction <minimumf>, %34, %cst_16 [0] : vector<8x128xf32> to vector<128xf32>
    %44 = vector.shape_cast %43 : vector<128xf32> to vector<1x128xf32>
    %cst_17 = arith.constant dense<0x7F800000> : vector<128xf32>
    %45 = vector.multi_reduction <minimumf>, %36, %cst_17 [0] : vector<8x128xf32> to vector<128xf32>
    %46 = vector.shape_cast %45 : vector<128xf32> to vector<1x128xf32>
    %cst_18 = arith.constant dense<0xFF800000> : vector<128xf32>
    %47 = vector.multi_reduction <maximumf>, %39, %cst_18 [0] : vector<8x128xf32> to vector<128xf32>
    %48 = vector.shape_cast %47 : vector<128xf32> to vector<1x128xf32>
    %cst_19 = arith.constant dense<0xFF800000> : vector<128xf32>
    %49 = vector.multi_reduction <maximumf>, %42, %cst_19 [0] : vector<8x128xf32> to vector<128xf32>
    %50 = vector.shape_cast %49 : vector<128xf32> to vector<1x128xf32>
    %cst_20 = arith.constant 0.000000e+00 : f32
    %51 = vector.broadcast %cst_20 : f32 to vector<6x128xf32>
    %52 = tpu.concatenate %19, %21, %23, %26, %29, %32, %44, %46, %48, %50, %51 in 0 : vector<1x128xf32>, vector<1x128xf32>, vector<1x128xf32>, vector<1x128xf32>, vector<1x128xf32>, vector<1x128xf32>, vector<1x128xf32>, vector<1x128xf32>, vector<1x128xf32>, vector<1x128xf32>, vector<6x128xf32> -> vector<16x128xf32>
    %c0_21 = arith.constant 0 : index
    %c0_22 = arith.constant 0 : index
    %c0_23 = arith.constant 0 : index
    %53 = vector.load %arg3[%c0_21, %c0_22, %c0_23] : memref<1x16x128xf32, #tpu.memory_space<vmem>>, vector<1x16x128xf32>
    %54 = vector.shape_cast %53 : vector<1x16x128xf32> to vector<16x128xf32>
    %55 = vector.shape_cast %52 : vector<16x128xf32> to vector<1x16x128xf32>
    tpu.vector_store %arg3[%c0_21, %c0_22, %c0_23], %55 {strides = array<i32>} : memref<1x16x128xf32, #tpu.memory_space<vmem>>, vector<1x16x128xf32>,
    return
  }
  func.func @transform_0(%arg0: i32) -> (i32, i32) {
    %c0_i32 = arith.constant 0 : i32
    %c0_i32_0 = arith.constant 0 : i32
    return %arg0, %c0_i32 : i32, i32
  }
  func.func @transform_1(%arg0: i32) -> (i32, i32) {
    %c0_i32 = arith.constant 0 : i32
    %c0_i32_0 = arith.constant 0 : i32
    return %arg0, %c0_i32 : i32, i32
  }
  func.func @transform_2(%arg0: i32) -> (i32, i32, i32) {
    %c0_i32 = arith.constant 0 : i32
    %c0_i32_0 = arith.constant 0 : i32
    %c0_i32_1 = arith.constant 0 : i32
    return %arg0, %c0_i32, %c0_i32_0 : i32, i32, i32
  }
}

</mosaic_0001>

<bundles_post_ra>
// kernel: tpu_custom_call.1
= control target key start
LH: loop header
LB: loop body
LE: loop exit
PB: predicated region body
PF: predicated region fallthrough
CT: control target
= control target key end

     0   :  { %7 = vsyncpa [#allocation3], 0  ;;  %s265_s0 = inlined_call_operand.hbm [shape: f32[8,128], index: 0, kind: input, shape index: {}]   ;;  %s266_s1 = inlined_call_operand.hbm [shape: f32[8,128], index: 1, kind: input, shape index: {}]   ;;  %s267_s2 = inlined_call_operand.hbm [shape: f32[1,16,128], index: 2, kind: output, shape index: {}]  }
   0x1   :  { %8 = vsyncpa [#allocation6], 0 }
   0x2   :  { %9 = vsyncpa [#allocation4], 0  ;;  %s226_s9 = smov [#allocation2]   ;;  %s227_s11 = smov [#allocation5]  }
   0x3   :  { %s16_s10 = sshll.u32 %s226_s9, 4  ;;  %s26_s12 = sshll.u32 %s227_s11, 4  ;;  %s17_s10 = int_to_ptr.vmem [resolvable:$true] %s16_s10  ;;  %s27_s12 = int_to_ptr.vmem [resolvable:$true] %s26_s12 }
   0x4   :  { %s168_s13 = scalar_lea.vmem %s17_s10, 128  ;;  %p173_p1 = scmp.lt.s32.totalorder %s17_s10, %s17_s10 }
   0x5   :  { %p169_p0 = scmp.ne.s32.totalorder %s17_s10, %s168_s13  ;;  %p174_p2 = scmp.lt.s32.totalorder %s168_s13, %s168_s13 }
   0x7   :  { %p175_p3 = por %p174_p2, %p173_p1 }
   0x9   :  { %p176_p4 = pnand %p175_p3, %p169_p0 }
   0xb   :  { %179 = shalt.err (!%p176_p4)
}
   0xc   :  { %19 = dma.hbm_to_vmem [thread:$0]  %s265_s0, 128, %s17_s10, [#allocation3]  }
   0xd   :  { %s188_s16 = scalar_lea.vmem %s27_s12, 128  ;;  %p193_p6 = scmp.lt.s32.totalorder %s27_s12, %s27_s12 }
   0xe   :  { %p189_p5 = scmp.ne.s32.totalorder %s27_s12, %s188_s16  ;;  %p194_p7 = scmp.lt.s32.totalorder %s188_s16, %s188_s16 }
  0x10   :  { %p195_p8 = por %p194_p7, %p193_p6 }
  0x12   :  { %p196_p9 = pnand %p195_p8, %p189_p5 }
  0x14   :  { %199 = shalt.err (!%p196_p9)
}
  0x15   :  { %29 = dma.hbm_to_vmem [thread:$0]  %s266_s1, 128, %s27_s12, [#allocation6]  }
  0x16   :  { %220 = dma.done.wait [#allocation3], 128  }
  0x17   :  { %221 = vsyncadd [#allocation3], 4294967168 }
  0x18   :  { %222 = dma.done.wait [#allocation6], 128  }
  0x19   :  { %223 = vsyncadd [#allocation6], 4294967168  ;;  %v38_v0 = vlaneseq  ;;  %v36_v5 = vld [vmem:[#allocation2] sm:$0xff]  ;;  %v37_v6 = vld [vmem:[#allocation5] sm:$0xff]  ;;  %vm119_vm1 = vcmask 1040384   ;;  %vm121_vm2 = vcmask 1041408  }
  0x1a   :  { %vm123_vm3 = vcmask 1042432   ;;  %vm125_vm4 = vcmask 1043456   ;;  %vm127_vm5 = vcmask 1044480   ;;  %vm129_vm6 = vcmask 1045504   ;;  %s228_s0 = smov [#allocation7]  }
  0x1b   :  { %v39_v1 = vshrl.u32 %v38_v0, 7  ;;  %v41_v2 = vand.u32 127, %v38_v0  ;;  %vm131_vm7 = vcmask 1046528   ;;  %s142_s1 = sshll.u32 %s228_s0, 4  ;;  %s143_s1 = int_to_ptr.vmem [resolvable:$true] %s142_s1 }
  0x1c   :  { %s200_s19 = scalar_lea.vmem %s143_s1, 256  ;;  %p205_p11 = scmp.lt.s32.totalorder %s143_s1, %s143_s1 }
  0x1d   :  { %v45_v3 = vmul.u32 128, %v39_v1  ;;  %p201_p10 = scmp.ne.s32.totalorder %s143_s1, %s200_s19  ;;  %p206_p12 = scmp.lt.s32.totalorder %s200_s19, %s200_s19 }
  0x1f   :  { %v46_v4 = vadd.s32 %v45_v3, %v41_v2  ;;  %p207_p13 = por %p206_p12, %p205_p11 }
  0x21   :  { %vm47_vm0 = vcmp.lt.s32.totalorder %v46_v4, 64  ;;  %p208_p0 = pnand %p207_p13, %p201_p10 }
  0x22   :  { %v48_v7 = vsel %vm47_vm0, %v36_v5, 0.0  ;;  %v49_v8 = vsel %vm47_vm0, %v37_v6, 0.0  ;;  %v91_v9 = vsel %vm47_vm0, %v36_v5, inf  ;;  %v92_v10 = vsel %vm47_vm0, %v37_v6, inf }
  0x23   :  { %v50_v11 = vsub.f32 %v48_v7, %v49_v8  ;;  %v58_v12 = vrot.slane %v48_v7, 4  ;;  %v64_v13 = vrot.slane %v49_v8, 4  ;;  %v70_v14 = vmul.f32 %v48_v7, %v48_v7 }
  0x24   :  { %v77_v15 = vmul.f32 %v49_v8, %v49_v8  ;;  %v84_v16 = vmul.f32 %v49_v8, %v48_v7  ;;  %v95_v17 = vrot.slane %v91_v9, 4  ;;  %v101_v18 = vrot.slane %v92_v10, 4 }
  0x25   :  { %v51_v19 = vmul.f32 %v50_v11, %v50_v11  ;;  %v59_v20 = vadd.f32 %v58_v12, %v48_v7  ;;  %v65_v21 = vadd.f32 %v64_v13, %v49_v8  ;;  %v71_v22 = vrot.slane %v70_v14, 4 }
  0x26   :  { %v78_v23 = vrot.slane %v77_v15, 4  ;;  %v85_v24 = vrot.slane %v84_v16, 4  ;;  %v96_v25 = vmin.f32 %v91_v9, %v95_v17  ;;  %v102_v26 = vmin.f32 %v92_v10, %v101_v18 }
  0x27   :  { %v52_v27 = vrot.slane %v51_v19, 4  ;;  %v60_v28 = vrot.slane %v59_v20, 2  ;;  %v66_v29 = vrot.slane %v65_v21, 2  ;;  %v72_v30 = vadd.f32 %v71_v22, %v70_v14 }
  0x28   :  { %v79_v31 = vadd.f32 %v78_v23, %v77_v15  ;;  %v86_v32 = vadd.f32 %v85_v24, %v84_v16  ;;  %v97_v33 = vrot.slane %v96_v25, 2  ;;  %v103_v34 = vrot.slane %v102_v26, 2 }
  0x29   :  { %v53_v35 = vadd.f32 %v52_v27, %v51_v19  ;;  %v61_v36 = vadd.f32 %v60_v28, %v59_v20  ;;  %v67_v37 = vadd.f32 %v66_v29, %v65_v21  ;;  %v73_v38 = vrot.slane %v72_v30, 2 }
  0x2a   :  { %v80_v39 = vrot.slane %v79_v31, 2  ;;  %v87_v40 = vrot.slane %v86_v32, 2  ;;  %v98_v47 = vmin.f32 %v96_v25, %v97_v33  ;;  %v104_v50 = vmin.f32 %v102_v26, %v103_v34 }
  0x2b   :  { %v54_v41 = vrot.slane %v53_v35, 2  ;;  %v62_v42 = vrot.slane %v61_v36, 1  ;;  %v74_v43 = vadd.f32 %v73_v38, %v72_v30  ;;  %v68_v44 = vrot.slane %v67_v37, 1 }
  0x2c   :  { %v81_v45 = vadd.f32 %v80_v39, %v79_v31  ;;  %v88_v46 = vadd.f32 %v87_v40, %v86_v32  ;;  %v93_v55 = vsel %vm47_vm0, %v36_v5, -inf  ;;  %v94_v56 = vsel %vm47_vm0, %v37_v6, -inf }
  0x2d   :  { %v55_v48 = vadd.f32 %v54_v41, %v53_v35  ;;  %v75_v49 = vrot.slane %v74_v43, 1  ;;  %v63_v51 = vadd.f32 %v62_v42, %v61_v36  ;;  %v69_v57 = vadd.f32 %v68_v44, %v67_v37 }
  0x2e   :  { %v82_v52 = vrot.slane %v81_v45, 1  ;;  %v89_v54 = vrot.slane %v88_v46, 1  ;;  %v99_v58 = vrot.slane %v98_v47, 1  ;;  %v107_v59 = vrot.slane %v93_v55, 4 }
  0x2f   :  { %v56_v53 = vrot.slane %v55_v48, 1  ;;  %v113_v60 = vrot.slane %v94_v56, 4  ;;  %v76_v62 = vadd.f32 %v75_v49, %v74_v43  ;;  %v105_v63 = vrot.slane %v104_v50, 1 }
  0x30   :  { %v83_v0 = vadd.f32 %v82_v52, %v81_v45  ;;  %v108_v1 = vmax.f32 %v93_v55, %v107_v59  ;;  %v90_v3 = vadd.f32 %v89_v54, %v88_v46  ;;  %v100_v5 = vmin.f32 %v98_v47, %v99_v58 }
  0x31   :  { %v57_v61 = vadd.f32 %v56_v53, %v55_v48  ;;  %v114_v2 = vmax.f32 %v94_v56, %v113_v60  ;;  %v106_v9 = vmin.f32 %v104_v50, %v105_v63 }
  0x32   :  { %v109_v6 = vrot.slane %v108_v1, 2 }
  0x33   :  { %v120_v7 = vsel %vm119_vm1, %v57_v61, %v63_v51  ;;  %v115_v8 = vrot.slane %v114_v2, 2 }
  0x34   :  { %v122_v4 = vsel %vm121_vm2, %v120_v7, %v69_v57  ;;  %v110_v12 = vmax.f32 %v108_v1, %v109_v6 }
  0x35   :  { %v124_v10 = vsel %vm123_vm3, %v122_v4, %v76_v62  ;;  %v116_v13 = vmax.f32 %v114_v2, %v115_v8 }
  0x36   :  { %v126_v11 = vsel %vm125_vm4, %v124_v10, %v83_v0  ;;  %v111_v16 = vrot.slane %v110_v12, 1 }
  0x37   :  { %v128_v14 = vsel %vm127_vm5, %v126_v11, %v90_v3  ;;  %v117_v17 = vrot.slane %v116_v13, 1 }
  0x38   :  { %v130_v15 = vsel %vm129_vm6, %v128_v14, %v100_v5  ;;  %v112_v19 = vmax.f32 %v110_v12, %v111_v16 }
  0x39   :  { %v132_v18 = vsel %vm131_vm7, %v130_v15, %v106_v9  ;;  %v118_v20 = vmax.f32 %v116_v13, %v117_v17 }
  0x3a   :  { %135 = vst [vmem:[#allocation7] sm:$0xff] %v132_v18 }
  0x3b   :  { %v133_v21 = vsel %vm119_vm1, %v112_v19, %v118_v20 }
  0x3c   :  { %v134_v22 = vsel %vm121_vm2, %v133_v21, 0.0 }
  0x3d   :  { %136 = vst [vmem:[#allocation7 + $0x8] sm:$0xff] %v134_v22 }
  0x3e   :  { %211 = shalt.err (!%p208_p0)
}
  0x3f   :  { %s229_s20 = smov 128   ;;  %s230_s21 = smov 8  }
  0x40   :  { %148 = dma.vmem_to_hbm [thread:$0]  %s143_s1, 256, %s267_s2, [#allocation4], %s229_s20, %s229_s20, %s230_s21  }
  0x41   :  { %224 = dma.done.wait [#allocation4], 256  }
  0x42   :  { %225 = vsyncadd [#allocation4], 4294967040 }
  0x43   :  { %152 = vsyncpa [#allocation3], 1 }
  0x44   :  { %153 = vsyncpa [#allocation6], 1 }
  0x45   :  { %154 = vsyncpa [#allocation4], 1 }

</bundles_post_ra>
